<compile_context>
chip_gen: v5e
topology: v5e:2x2
jax: 0.10.0
libtpu: 0.0.40
codegen_flags: <defaults>
</compile_context>

<pallas_src>
import functools

import jax
import jax.numpy as jnp
from jax.experimental import pallas as pl
from jax.experimental.pallas import tpu as pltpu


# MXU input dtypes for the two attention matmuls (accumulation is always f32).
_QK_MATMUL_DTYPE = jnp.float32   # set to jnp.bfloat16 on v6e/v7x at scale
_PV_MATMUL_DTYPE = jnp.bfloat16


def _attention_kernel(x_ref, w_ref, o_ref, *, out_p):
    # x_ref: (Bt, S, D)   w_ref: (D, 3*out_p)   o_ref: (Bt, S, out_p)
    Bt, S, D = x_ref.shape

    # One fused, lane-dense projection matmul: (Bt*S, D) @ (D, 3*out_p).
    # The (Bt, S, D) -> (Bt*S, D) reshape is sublane-major stacking (free).
    x2 = x_ref[...].reshape(Bt * S, D).astype(jnp.float32)
    qkv = jnp.dot(x2, w_ref[...], preferred_element_type=jnp.float32)

    # Lane-aligned slices of the fused result.  1/sqrt(output_dim) is already
    # folded into the wq columns of w_ref.
    q = qkv[:, 0 * out_p:1 * out_p].reshape(Bt, S, out_p)
    k = qkv[:, 1 * out_p:2 * out_p].reshape(Bt, S, out_p)
    v = qkv[:, 2 * out_p:3 * out_p].reshape(Bt, S, out_p)

    # QK^T: contract the last dims directly -- no transposed copy of k.
    s = jnp.einsum(
        "bqe,bke->bqk",
        q.astype(_QK_MATMUL_DTYPE),
        k.astype(_QK_MATMUL_DTYPE),
        preferred_element_type=jnp.float32,
    )

    # Numerically-stable softmax along the last axis (f32 math).
    s = s - jnp.max(s, axis=-1, keepdims=True)
    p = jnp.exp(s)
    p = p * pl.reciprocal(jnp.sum(p, axis=-1, keepdims=True), approx=True)

    # PV matmul in bf16 on the MXU, f32 accumulate; lane-dense store.
    o = jnp.einsum(
        "bqk,bke->bqe",
        p.astype(_PV_MATMUL_DTYPE),
        v.astype(_PV_MATMUL_DTYPE),
        preferred_element_type=jnp.float32,
    )
    o_ref[...] = o.astype(o_ref.dtype)


def _pick_batch_tile(B, S):
    """Batch elements per grid step: aim for a few hundred rows of work per
    step, but keep >= 2 grid steps when the batch allows it (v7x: 2 TCs)."""
    target_rows = 512
    divisors = [d for d in range(1, B + 1) if B % d == 0]
    cands = [d for d in divisors if B // d >= 2] or divisors
    good = [d for d in cands if d * S <= target_rows]
    return max(good) if good else min(cands)


def attention_module(x, kernel):
    """x: (B, S, D_in) f32; kernel: (3, D_in, output_dim) -> (B, S, output_dim)."""
    B, S, D = x.shape
    assert kernel.shape[0] == 3 and kernel.shape[1] == D
    output_dim = kernel.shape[2]

    # Lane-dense (multiple-of-128) feature dim for the padded projections.
    out_p = max(128, pl.cdiv(output_dim, 128) * 128)
    pad = out_p - output_dim
    scale = 1.0 / (float(output_dim) ** 0.5)

    def _pad_cols(w):
        return jnp.pad(w, ((0, 0), (0, pad))) if pad else w

    # Fused weight: [wq * scale | wk | wv], each zero-padded to out_p columns.
    # Zero q/k columns contribute nothing to QK^T; zero v columns produce zero
    # output columns which are sliced off below.
    w_fused = jnp.concatenate(
        [_pad_cols(kernel[0] * scale), _pad_cols(kernel[1]), _pad_cols(kernel[2])],
        axis=1,
    ).astype(jnp.float32)

    Bt = _pick_batch_tile(B, S)
    grid = (B // Bt,)

    out = pl.pallas_call(
        functools.partial(_attention_kernel, out_p=out_p),
        out_shape=jax.ShapeDtypeStruct((B, S, out_p), x.dtype),
        grid_spec=pltpu.PrefetchScalarGridSpec(
            num_scalar_prefetch=0,
            grid=grid,
            in_specs=[
                pl.BlockSpec((Bt, S, D), lambda b: (b, 0, 0)),
                # Constant index_map: the single fused weight is the only
                # weight buffer (could additionally use pipeline_mode=
                # pl.Buffered(1) to drop its second pipeline buffer).
                pl.BlockSpec((D, 3 * out_p), lambda b: (0, 0)),
            ],
            out_specs=pl.BlockSpec((Bt, S, out_p), lambda b: (b, 0, 0)),
        ),
        compiler_params=pltpu.CompilerParams(
            dimension_semantics=("parallel",),
        ),
    )(x, w_fused)

    # Drop the zero-padded feature columns (layout plumbing outside the kernel).
    return out[:, :, :output_dim]


def attention_module_ref(x, kernel):
    # Pure-JAX reference (mirrors the PyTorch forward exactly, all f32).
    output_dim = kernel.shape[2]
    wq = jnp.einsum("bsd,de->bse", x, kernel[0])
    wk = jnp.einsum("bsd,de->bse", x, kernel[1])
    wv = jnp.einsum("bsd,de->bse", x, kernel[2])
    qk = jnp.einsum("bqe,bke->bqk", wq, wk) / (output_dim ** 0.5)
    qk = jax.nn.softmax(qk, axis=-1)
    return jnp.einsum("bqk,bke->bqe", qk, wv)


if __name__ == "__main__":
    key = jax.random.PRNGKey(0)
    kx, kw, kx2 = jax.random.split(key, 3)

    # Small shapes consistent with the module: (batch, seq, feature).
    B, S, D_in, output_dim = 2, 8, 32, 32
    x = jax.random.normal(kx, (B, S, D_in), dtype=jnp.float32)
    # nn.init.uniform_ defaults to U[0, 1)
    kernel = jax.random.uniform(kw, (3, D_in, output_dim), dtype=jnp.float32)

    out = attention_module(x, kernel)
    out = jax.block_until_ready(out)
    ref = attention_module_ref(x, kernel)
    assert out.shape == (B, S, output_dim)
    # Tolerance accounts for bf16 PV matmul + approx softmax reciprocal.
    assert jnp.allclose(out, ref, atol=2e-2, rtol=2e-2), "mismatch vs reference"

    # Second check exercising the multi-batch-per-grid-step path (Bt > 1).
    B2 = 16
    x2 = jax.random.normal(kx2, (B2, S, D_in), dtype=jnp.float32)
    out2 = jax.block_until_ready(attention_module(x2, kernel))
    ref2 = attention_module_ref(x2, kernel)
    assert out2.shape == (B2, S, output_dim)
    assert jnp.allclose(out2, ref2, atol=2e-2, rtol=2e-2), "mismatch (batched)"

    print("KERNEL_OK")
</pallas_src>

<mosaic_0001>
module attributes {stable_mosaic.version = 11 : i64} {
  func.func @_attention_kernel(%arg0: i32, %arg1: memref<1x8x32xf32, #tpu.memory_space<vmem>>, %arg2: memref<32x384xf32, #tpu.memory_space<vmem>>, %arg3: memref<1x8x128xf32, #tpu.memory_space<vmem>>) attributes {dimension_semantics = [#tpu.dimension_semantics<parallel>], iteration_bounds = array<i64: 2>, scalar_prefetch = 0 : i64, scratch_operands = 0 : i64, tpu.core_type = #tpu.core_type<tc>, window_params = [{transform_indices = @transform_0, window_bounds = array<i64: 1, 8, 32>}, {pipeline_mode = #tpu.pipeline_mode<synchronous>, transform_indices = @transform_1, window_bounds = array<i64: 32, 384>}, {transform_indices = @transform_2, window_bounds = array<i64: 1, 8, 128>}]} {
    %c0 = arith.constant 0 : index
    %c0_0 = arith.constant 0 : index
    %c0_1 = arith.constant 0 : index
    %0 = vector.load %arg1[%c0, %c0_0, %c0_1] : memref<1x8x32xf32, #tpu.memory_space<vmem>>, vector<1x8x32xf32>
    %1 = vector.shape_cast %0 : vector<1x8x32xf32> to vector<8x32xf32>
    %c0_2 = arith.constant 0 : index
    %c0_3 = arith.constant 0 : index
    %2 = vector.load %arg2[%c0_2, %c0_3] : memref<32x384xf32, #tpu.memory_space<vmem>>, vector<32x384xf32>
    %cst = arith.constant dense<0.000000e+00> : vector<8x384xf32>
    %3 = tpu.matmul %1, %2, %cst {dimension_numbers = #tpu.dot_dimension_numbers<[1], [0], [0], [1], [0, 0, 1, 1], [], []>} : vector<8x32xf32>, vector<32x384xf32>, vector<8x384xf32> -> vector<8x384xf32>
    %4 = vector.extract_strided_slice %3 {offsets = [0, 0], sizes = [8, 128], strides = [1, 1]} : vector<8x384xf32> to vector<8x128xf32>
    %5 = vector.shape_cast %4 : vector<8x128xf32> to vector<1x8x128xf32>
    %6 = vector.extract_strided_slice %3 {offsets = [0, 128], sizes = [8, 128], strides = [1, 1]} : vector<8x384xf32> to vector<8x128xf32>
    %7 = vector.shape_cast %6 : vector<8x128xf32> to vector<1x8x128xf32>
    %8 = vector.extract_strided_slice %3 {offsets = [0, 256], sizes = [8, 128], strides = [1, 1]} : vector<8x384xf32> to vector<8x128xf32>
    %9 = vector.shape_cast %8 : vector<8x128xf32> to vector<1x8x128xf32>
    "tpu.trace_start"() <{level = 10 : i32, message = "bqe,bke->bqk"}> : () -> ()
    %cst_4 = arith.constant dense<0.000000e+00> : vector<1x8x8xf32>
    %10 = tpu.matmul %5, %7, %cst_4 {dimension_numbers = #tpu.dot_dimension_numbers<[2], [2], [1], [1], [0, 0, 0, 1, 1, 1], [0], [0]>} : vector<1x8x128xf32>, vector<1x8x128xf32>, vector<1x8x8xf32> -> vector<1x8x8xf32>
    "tpu.trace_stop"() : () -> ()
    %cst_5 = arith.constant dense<0xFF800000> : vector<1x8xf32>
    %11 = vector.multi_reduction <maximumf>, %10, %cst_5 [2] : vector<1x8x8xf32> to vector<1x8xf32>
    %12 = vector.shape_cast %11 : vector<1x8xf32> to vector<1x8x1xf32>
    %13 = vector.broadcast %12 : vector<1x8x1xf32> to vector<1x8x8xf32>
    %14 = arith.subf %10, %13 : vector<1x8x8xf32>
    %15 = math.exp %14 : vector<1x8x8xf32>
    %cst_6 = arith.constant dense<0.000000e+00> : vector<1x8xf32>
    %16 = vector.multi_reduction <add>, %15, %cst_6 [2] : vector<1x8x8xf32> to vector<1x8xf32>
    %17 = vector.shape_cast %16 : vector<1x8xf32> to vector<1x8x1xf32>
    %18 = tpu.reciprocal %17 {approx = true} : vector<1x8x1xf32> -> vector<1x8x1xf32>
    %19 = vector.broadcast %18 : vector<1x8x1xf32> to vector<1x8x8xf32>
    %20 = arith.mulf %15, %19 : vector<1x8x8xf32>
    %21 = arith.truncf %20 : vector<1x8x8xf32> to vector<1x8x8xbf16>
    %22 = arith.truncf %9 : vector<1x8x128xf32> to vector<1x8x128xbf16>
    "tpu.trace_start"() <{level = 10 : i32, message = "bqk,bke->bqe"}> : () -> ()
    %cst_7 = arith.constant dense<0.000000e+00> : vector<1x8x128xf32>
    %23 = tpu.matmul %21, %22, %cst_7 {dimension_numbers = #tpu.dot_dimension_numbers<[2], [1], [1], [2], [0, 0, 0, 1, 1, 2], [0], [0]>} : vector<1x8x8xbf16>, vector<1x8x128xbf16>, vector<1x8x128xf32> -> vector<1x8x128xf32>
    "tpu.trace_stop"() : () -> ()
    %c0_8 = arith.constant 0 : index
    %c0_9 = arith.constant 0 : index
    %c0_10 = arith.constant 0 : index
    %24 = vector.load %arg3[%c0_8, %c0_9, %c0_10] : memref<1x8x128xf32, #tpu.memory_space<vmem>>, vector<1x8x128xf32>
    tpu.vector_store %arg3[%c0_8, %c0_9, %c0_10], %23 {strides = array<i32>} : memref<1x8x128xf32, #tpu.memory_space<vmem>>, vector<1x8x128xf32>,
    return
  }
  func.func @transform_0(%arg0: i32) -> (i32, i32, i32) {
    %c0_i32 = arith.constant 0 : i32
    %c0_i32_0 = arith.constant 0 : i32
    %c0_i32_1 = arith.constant 0 : i32
    return %arg0, %c0_i32, %c0_i32_0 : i32, i32, i32
  }
  func.func @transform_1(%arg0: i32) -> (i32, i32) {
    %c0_i32 = arith.constant 0 : i32
    %c0_i32_0 = arith.constant 0 : i32
    %c0_i32_1 = arith.constant 0 : i32
    return %c0_i32, %c0_i32_0 : i32, i32
  }
  func.func @transform_2(%arg0: i32) -> (i32, i32, i32) {
    %c0_i32 = arith.constant 0 : i32
    %c0_i32_0 = arith.constant 0 : i32
    %c0_i32_1 = arith.constant 0 : i32
    return %arg0, %c0_i32, %c0_i32_0 : i32, i32, i32
  }
}

</mosaic_0001>

<bundles_post_ra>
// kernel: tpu_custom_call.1
= control target key start
LH: loop header
LB: loop body
LE: loop exit
PB: predicated region body
PF: predicated region fallthrough
CT: control target
= control target key end

     0   :  { %7 = vsyncpa [#allocation3], 0  ;;  %s784_s0 = inlined_call_operand.hbm [shape: f32[2,8,32], index: 0, kind: input, shape index: {}]   ;;  %s785_s1 = inlined_call_operand.hbm [shape: f32[32,384], index: 1, kind: input, shape index: {}]   ;;  %s786_s2 = inlined_call_operand.hbm [shape: f32[2,8,128], index: 2, kind: output, shape index: {}]  }
   0x1   :  { %9 = vsyncpa [#allocation3 + $0x1], 0 }
   0x2   :  { %10 = vsyncpa [#allocation6], 0 }
   0x3   :  { %11 = vsyncpa [#allocation4], 0 }
   0x4   :  { %13 = vsyncpa [#allocation4 + $0x1], 0  ;;  %s638_s9 = smov 0   ;;  %s640_s10 = smov 0  }
   0x5   :  { %s642_s11 = smov 0   ;;  %s644_s12 = smov 0  }
   0x6 LB: > { %s108_s15 = sshll.u32 %s785_s1, 4  ;;  %s662_s16 = sadd.s32 4294967295, %s618_s12   ;;  %s618_s12 = sphi %s644_s12, %s796_s12   ;;  %s614_s11 = sphi %s642_s11, %s795_s11   ;;  %s610_s10 = sphi %s640_s10, %s794_s10   ;;  %s606_s9 = sphi %s638_s9, %s793_s9   ;;  %s109_s15 = int_to_ptr.hbm [resolvable:$true] %s108_s15 }
   0x7   : > { %p408_p0 = scmp.ge.s32.totalorder %s618_s12, 1  ;;  %p40_p1 = scmp.eq.s32.totalorder %s662_s16, 0 }
   0x8   : > { %p97_p2 = scmp.lt.s32.totalorder %s618_s12, 3  ;;  %s620_s18 = smov [#allocation5]  }
   0x9   : > { %s110_s19 = sshll.u32 %s620_s18, 4  ;;  %s621_s20 = smov 384   ;;  %s111_s19 = int_to_ptr.vmem [resolvable:$true] %s110_s19 }
   0xa   : > { %p667_p3 = pnand %p408_p0, %p97_p2  ;;  %s622_s21 = smov 24  }
   0xb   : > { %s407_s22 = sadd.s32 4294967294, %s618_s12   ;;  %s678_s23 = sadd.s32 1, %s618_s12  }
   0xc   : > { %p433_p4 = pneg %p667_p3  ;;  %s26_s24 = sadd.s32 1, %s614_s11 }
   0xd   : > { %s23_s25 = ssub.s32 %s618_s12, %s678_s23  ;;  %p33_p7 = scmp.ne.s32.totalorder %s614_s11, %s610_s10 }
   0xe   : > { %p434_p6 = pnand %p433_p4, %p40_p1  ;;  %p24_p8 = scmp.eq.s32.totalorder %s23_s25, 0 }
   0xf   : > { %p34_p9 = scmp.eq.s32.totalorder %s618_s12, 0  ;;  %p39_p10 = scmp.ne.s32.totalorder %s610_s10, %s606_s9 }
  0x10   : > { %436 = dma.hbm_to_vmem [thread:$0]  (!%p434_p6), %s109_s15, 1536, %s111_s19, [#allocation6], %s621_s20, %s621_s20, %s622_s21  }
  0x11   : > { %p84_p11 = scmp.eq.s32.totalorder %s662_s16, 1  ;;  %p694_p12 = por %p40_p1, %p39_p10 }
  0x12   : > { %s690_s26 = scalar_select %p24_p8, %s614_s11, %s26_s24  }
  0x13   : > { %p698_p13 = por %p84_p11, %p33_p7  ;;  %p90_p0 = scmp.eq.s32.totalorder %s407_s22, 1 }
  0x14   : > { %p35_p2 = por %p34_p9, %p33_p7  ;;  %s124_s29 = sand.u32 1, %s614_s11  }
  0x15   : > { %p703_p4 = por %p90_p0, %p39_p10  ;;  %p446_p6 = scmp.lt.s32.totalorder %s618_s12, 2 }
  0x16   : > { %s411_s3 = sshll.u32 %s124_s29, 3  ;;  %s412_s4 = sshll.u32 %s618_s12, 3 }
  0x17   : > { %s132_s7 = scalar_lea.hbm %s784_s0, %s412_s4  ;;  %s128_s13 = scalar_lea.vmem [#allocation2], %s411_s3 }
  0x18   : > { %s134_s8 = sshll.u32 %s132_s7, 4  ;;  %s136_s14 = sshll.u32 %s128_s13, 4  ;;  %s135_s8 = int_to_ptr.hbm [resolvable:$true] %s134_s8  ;;  %s137_s14 = int_to_ptr.vmem [resolvable:$true] %s136_s14 }
  0x19   : > { %p712_p8 = pnand %p446_p6, %p35_p2  ;;  %s125_s18 = scalar_lea.sflag [#allocation3], %s124_s29 }
  0x1a   : > { %s518_s19 = sshra.s32 %s135_s8, 4  ;;  %s525_s24 = scalar_lea.hbm %s784_s0, 16  ;;  %s519_s19 = int_to_ptr.hbm [resolvable:$true] %s518_s19 }
  0x1b   : > { %s520_s20 = scalar_lea.hbm %s519_s19, 8  ;;  %p522_p9 = pneg %p712_p8 }
  0x1c   : > { %p521_p7 = scmp.ne.s32.totalorder %s519_s19, %s520_s20  ;;  %p526_p0 = scmp.lt.s32.totalorder %s519_s19, %s784_s0 }
  0x1d   : > { %p527_p2 = scmp.lt.s32.totalorder %s525_s24, %s520_s20 }
  0x1e   : > { %p523_p10 = pnand %p522_p9, %p521_p7 }
  0x1f   : > { %p528_p6 = por %p527_p2, %p526_p0 }
  0x20   : > { %p524_p11 = pneg %p523_p10 }
  0x22   : > { %p529_p5 = pnand %p528_p6, %p524_p11 }
  0x24   : > { %532 = shalt.err (!%p529_p5)
}
  0x25   : > { %440 = dma.hbm_to_vmem [thread:$0]  (!%p712_p8), %s135_s8, 128, %s137_s14, %s125_s18  }
  0x26   : > { %145 = sbr.rel (%p667_p3) target bundleno = 705 (0x2c1), region = 28  ;;  %s729_s29 = sand.u32 (!%p667_p3), 1, %s610_s10  }
  0x27   : > { %s414_s4 = sshll.u32 (!%p667_p3), %s729_s29, 3  ;;  %s148_s5 = scalar_lea.sflag (!%p667_p3), [#allocation3], %s729_s29 }
  0x28   : > { %s151_s6 = scalar_lea.vmem (!%p667_p3), [#allocation2], %s414_s4 }
  0x2b   : > { %593 = dma.done.wait (%p694_p12), %s148_s5, 128  }
  0x2c   : > { %595 = vsyncadd (%p694_p12), %s148_s5, 4294967168 }
  0x2d   : > { %597 = dma.done.wait (%p40_p1), [#allocation6], 1536  }
  0x2e   : > { %599 = vsyncadd (%p40_p1), [#allocation6], 4294965760  ;;  %v190_v0 = vld [vmem:[#allocation5 + $0x50] sm:$0xff]  ;;  %v187_v1 = vld [vmem:[#allocation5 + $0x38] sm:$0xff]  ;;  %vm192_vm0 = vcmask 261120   ;;  %vm276_vm1 = vcmask 64512  }
  0x2f   : > { %v189_v2 = vld [vmem:[#allocation5 + $0x48] sm:$0xff]  ;;  %228 = vmatpush.msra.mxu1 %v190_v0  ;;  %v186_v3 = vld [vmem:[#allocation5 + $0x30] sm:$0xff]  ;;  %v184_v4 = vld [vmem:[#allocation5 + $0x20] sm:$0xff]  ;;  %vm293_vm2 = vcmask 1043456   ;;  %s422_s17 = sshll.u32 %s662_s16, 3  ;;  %s177_s13 = scalar_lea.vmem [#allocation7], %s414_s4 }
  0x30   : > { %208 = vmatpush.msra.mxu0 %v189_v2  ;;  %v183_v5 = vld [vmem:[#allocation5 + $0x18] sm:$0xff]  ;;  %v181_v6 = vld [vmem:[#allocation5 + $0x8] sm:$0xff]  ;;  %v180_v7 = vld [vmem:[#allocation5] sm:$0xff]  ;;  %s322_s8 = scalar_lea.hbm %s786_s2, %s422_s17  ;;  %s324_s14 = sshll.u32 %s177_s13, 4  ;;  %s325_s14 = int_to_ptr.vmem [resolvable:$true] %s324_s14 }
  0x31   : > { %229 = vmatpush.msra.mxu1 %v187_v1  ;;  %v179_v8 = vld [vmem:[%s151_s6] sm:$0xff]  ;;  %v188_v12 = vld [vmem:[#allocation5 + $0x40] sm:$0xff]  ;;  %v185_v13 = vld [vmem:[#allocation5 + $0x28] sm:$0xff]  ;;  %s326_s15 = sshll.u32 %s322_s8, 4  ;;  %s312_s18 = scalar_lea.sflag [#allocation4], %s729_s29  ;;  %s327_s15 = int_to_ptr.hbm [resolvable:$true] %s326_s15 }
  0x32   : > { %209 = vmatpush.msra.mxu0 %v186_v3  ;;  %v191_v11 = vld [vmem:[#allocation5 + $0x58] sm:$0xff]  ;;  %v182_v16 = vld [vmem:[#allocation5 + $0x10] sm:$0xff]  ;;  %s562_s19 = sshra.s32 %s327_s15, 4  ;;  %s568_s22 = scalar_lea.hbm %s786_s2, 16  ;;  %s563_s19 = int_to_ptr.hbm [resolvable:$true] %s562_s19 }
  0x33   : > { %230 = vmatpush.msra.mxu1 %v184_v4  ;;  %248 = vmatpush.msra.mxu2 %v191_v11  ;;  %s564_s20 = scalar_lea.hbm %s563_s19, 8  ;;  %p569_p12 = scmp.lt.s32.totalorder %s563_s19, %s786_s2 }
  0x34   : > { %210 = vmatpush.msra.mxu0 %v183_v5  ;;  %p565_p1 = scmp.ne.s32.totalorder %s563_s19, %s564_s20  ;;  %p570_p8 = scmp.lt.s32.totalorder %s568_s22, %s564_s20 }
  0x35   : > { %231 = vmatpush.msra.mxu1 %v181_v6  ;;  %249 = vmatpush.msra.mxu2 %v188_v12 }
  0x36   : > { %211 = vmatpush.msra.mxu0 %v180_v7  ;;  %418 = vmatmul.msk.f32.vlgmr.msra.gmra.mxu1 %vm192_vm0, %v179_v8  ;;  %p566_p3 = pnand %p565_p1, %p698_p13  ;;  %p571_p7 = por %p570_p8, %p569_p12 }
  0x37   : > { %417 = vmatmul.msk.f32.vlgmr.msra.gmra.mxu0 %vm192_vm0, %v179_v8  ;;  %250 = vmatpush.msra.mxu2 %v185_v13 }
  0x38   : > { %p567_p5 = pneg %p566_p3 }
  0x39   : > { %251 = vmatpush.msra.mxu2 %v182_v16 }
  0x3a   : > { %419 = vmatmul.msk.f32.vlgmr.msra.gmra.mxu2 %vm192_vm0, %v179_v8  ;;  %p572_p9 = pnand %p571_p7, %p567_p5 }
  0xb3   : > { %v233_v9 = vpop.f32.mrf.mxu1 }
  0xb4   : > { %271 = vmatpush.xpose.msrb.mxu0 %v233_v9  ;;  %v213_v10 = vpop.f32.mrf.mxu0 }
  0xb7   : > { %272 = vmatmul.f32.vlgmr.msrb.gmra.mxu0 %v213_v10 }
  0xbd   : > { %v253_v22 = vpop.f32.mrf.mxu2 }
  0xbe   : > { %v289_v23 = vpack.c.bf16 %v253_v22, %v253_v22 }
  0xc0   : > { %v295_v24 = vsel %vm293_vm2, %v289_v23, 0 }
  0xc1   : > { %304 = vmatpush.bf16.msra.mxu3 %v295_v24 }
 0x134   : > { %v273_v14 = vpop.f32.mrf.mxu0 }
 0x135   : > { %v277_v15 = vsel %vm276_vm1, %v273_v14, -inf }
 0x136   : > { %278 = vmax.xlane.f32.xlu0 %v277_v15 }
 0x1a9   : > { %v279_v17 = vpop.xlane.xlu0 %278 }
 0x1aa   : > { %v280_v18 = vsub.f32 %v273_v14, %v279_v17 }
 0x1ac   : > { %v281_v19 = vmul.f32 1.442695, %v280_v18 }
 0x1ae   : > { %484 = vpow2.f32 %v281_v19 }
 0x1b4   : > { %v485_v20 = vpop.eup %484 }
 0x1b5   : > { %v283_v21 = vsel %vm276_vm1, %v485_v20, 0.0 }
 0x1b6   : > { %284 = vadd.xlane.f32.xlu0 %v283_v21 }
 0x229   : > { %v285_v25 = vpop.xlane.xlu0 %284 }
 0x22a   : > { %486 = vrcp.f32 %v285_v25 }
 0x230   : > { %v487_v26 = vpop.eup %486 }
 0x231   : > { %v287_v27 = vmul.f32 %v487_v26, %v485_v20 }
 0x233   : > { %v288_v28 = vpack.c.bf16 %v287_v27, %v287_v27 }
 0x235   : > { %420 = vmatmul.msk.bf16.vlgmr.msra.gmra.mxu3 %vm276_vm1, %v288_v28 }
 0x2b8   : > { %v306_v29 = vpop.f32.mrf.mxu3 }
 0x2b9   : > { %310 = vst [vmem:[%s177_s13] sm:$0xff] %v306_v29 }
 0x2ba   : > { %575 = shalt.err (!%p572_p9)
}
 0x2bb   : > { %431 = dma.vmem_to_hbm [thread:$0]  (%p698_p13), %s325_s14, 128, %s327_s15, %s312_s18  }
 0x2c0   : > { %v308_v30 = vpop.f32.mrf.mxu3 }
 0x2c1 PF: > { %s338_s3 = sand.u32 1, %s606_s9   ;;  %p792_p10 = scmp.ge.s32.totalorder %s618_s12, 2 }
 0x2c2   : > { %s339_s29 = scalar_lea.sflag [#allocation4], %s338_s3 }
 0x2c3   : > { %p442_p11 = pnand %p792_p10, %p703_p4 }
 0x2c5   : > { %p443_p0 = pneg %p442_p11 }
 0x2c7   : > { %601 = dma.done.wait (%p443_p0), %s339_s29, 128  }
 0x2c8   : > { %603 = vsyncadd (%p443_p0), %s339_s29, 4294967168  ;;  %p16_p2 = scmp.ge.s32.totalorder %s678_s23, 4   ;;  %s793_s9 = smov %s610_s10 }
 0x2c9   : > { %s794_s10 = smov %s614_s11  ;;  %s795_s11 = smov %s690_s26 }
 0x2ca   : > { %s796_s12 = smov %s678_s23  ;;  %18 = sbr.rel (!%p16_p2) target bundleno = 6 (0x6), region = 77 }
 0x2cf   :  { %345 = vsyncpa [#allocation3], 1 }
 0x2d0   :  { %347 = vsyncpa [#allocation3 + $0x1], 1 }
 0x2d1   :  { %348 = vsyncpa [#allocation6], 1 }
 0x2d2   :  { %349 = vsyncpa [#allocation4], 1 }
 0x2d3   :  { %351 = vsyncpa [#allocation4 + $0x1], 1 }

</bundles_post_ra>
